<compile_context>
chip_gen: v5e
topology: v5e:2x2
jax: 0.10.0
libtpu: 0.0.40
codegen_flags: <defaults>
</compile_context>

<pallas_src>
import jax
import jax.numpy as jnp
import numpy as np
from jax.experimental import pallas as pl
from jax.experimental.pallas import tpu as pltpu

CLIP_MEAN = (0.48145466, 0.4578275, 0.40821073)
CLIP_STD = (0.26862954, 0.26130258, 0.27577711)

_OUT_LANES = 128  # lane-dense output row (per-branch loss broadcast over 128 lanes)


def _round_up(x, m):
    return (x + m - 1) // m * m


# --------------------------------------------------------------------------
# Pass 1: HBM-bound feature-sum accumulation.  grid = (NC, nk_per_core);
# the outer axis is "parallel" (one partial slab per TensorCore on v7x),
# the inner axis is the F reduction ("arbitrary").  The output slab is the
# accumulator (resident across k), zeroed under pl.when(k == 0).
# --------------------------------------------------------------------------
def _accum_kernel(x_ref, w_ref, part_ref):
    k = pl.program_id(1)

    @pl.when(k == 0)
    def _init():
        part_ref[...] = jnp.zeros_like(part_ref)

    # bf16 pixel block @ bf16 (normalization-folded) weight block, f32 accum.
    part_ref[...] += jnp.dot(x_ref[...], w_ref[...],
                             preferred_element_type=jnp.float32)


# --------------------------------------------------------------------------
# Pass 2: tiny epilogue (one invocation, everything fits in VMEM).
# Combine per-core partials, add the folded diff_norm bias, L2-normalize,
# and evaluate   loss_b = -(s^2/B^2) * (sum_{i in branch b} <I_hat_i, T_hat_b>)^2
# without ever materializing the [B,B] logits product.
# --------------------------------------------------------------------------
def _make_finalize_kernel(nb: int, batch: int, coef: float):
    def kernel(part_ref, bias_ref, that_ref, out_ref):
        feats = jnp.sum(part_ref[...], axis=0) + bias_ref[...]          # [R, Dp] f32
        feats = feats * jax.lax.rsqrt(
            jnp.sum(feats * feats, axis=-1, keepdims=True) + 1e-12)
        rows = jax.lax.broadcasted_iota(jnp.int32, feats.shape, 0)
        that = that_ref[...]                                            # [nb, Dp]
        losses = []
        for bi in range(nb):                                            # nb <= 2, static
            mask = (rows >= bi * batch) & (rows < bi * batch + batch)
            r = jnp.sum(jnp.where(mask, feats, 0.0), axis=0, keepdims=True)   # [1, Dp]
            s = jnp.sum(r * that[bi:bi + 1, :], axis=-1, keepdims=True)       # [1, 1]
            losses.append(-coef * s * s)
        loss_col = jnp.concatenate(losses, axis=0)                      # [nb, 1]
        out_ref[...] = jnp.broadcast_to(loss_col, out_ref.shape).astype(jnp.float32)

    return kernel


# --------------------------------------------------------------------------
# One-time parameter preparation (CLIP is frozen -> do this once, not per call).
# --------------------------------------------------------------------------
def prepare_clip_params(params, img_shape, *, dual=True, tk=4096, num_core_splits=2):
    B, C, H, W = img_shape
    F = C * H * W
    E, D = params["w_txt"].shape
    w_img = params["w_img"]
    assert w_img.shape == (F, D)

    nb = 2 if dual else 1
    NC = max(1, int(num_core_splits))

    # alignment: D -> 128 lanes, stacked rows -> multiple of 16 (bf16 packed
    # sublanes), F -> NC * tk tiles.
    Dp = _round_up(D, 128)
    R = _round_up(nb * B, 16)
    tk_eff = min(int(tk), _round_up(int(pl.cdiv(F, NC)), 128))
    tk_eff = max(128, _round_up(tk_eff, 128))
    Fp = _round_up(F, NC * tk_eff)
    nk_per_core = Fp // tk_eff // NC

    # fold diff_norm ((x - mean)/std per channel) into the image projection.
    mean = jnp.asarray(CLIP_MEAN, jnp.float32)
    std = jnp.asarray(CLIP_STD, jnp.float32)
    scale_f = jnp.repeat(1.0 / std, H * W)                               # [F]
    bias_f = jnp.repeat(-mean / std, H * W)                              # [F]
    w_img_n = jnp.pad(scale_f[:, None] * w_img,
                      ((0, Fp - F), (0, Dp - D))).astype(jnp.bfloat16)   # [Fp, Dp]
    bias_feat = jnp.pad(bias_f[None, :] @ w_img,
                        ((0, 0), (0, Dp - D))).astype(jnp.float32)       # [1, Dp]

    # precompute normalized text features per branch (branch-constant).
    def t_hat(tokens):
        pooled = jnp.mean(params["embed"][tokens], axis=0, keepdims=True)  # [1, E]
        tf = pooled @ params["w_txt"]
        tf = tf * jax.lax.rsqrt(jnp.sum(tf * tf, axis=-1, keepdims=True) + 1e-12)
        return jnp.pad(tf, ((0, 0), (0, Dp - D)))

    names = ["init", "target"] if dual else ["target"]
    that = jnp.concatenate([t_hat(params[n + "_tokens"]) for n in names],
                           axis=0).astype(jnp.float32)                  # [nb, Dp]

    return {
        "w_img_n": w_img_n,
        "bias_feat": bias_feat,
        "t_hat": that,
        "logit_scale": float(params["logit_scale"]),
        "dual": dual,
        "dims": dict(B=B, C=C, H=H, W=W, F=F, Fp=Fp, Dp=Dp, R=R,
                     nb=nb, NC=NC, tk=tk_eff, nk_per_core=nk_per_core),
    }


# --------------------------------------------------------------------------
# Kernel driver: stacked pixels -> per-branch losses [nb].
# --------------------------------------------------------------------------
def _branch_losses_from_pixels(x_stacked, prep):
    d = prep["dims"]
    R, Fp, Dp = d["R"], d["Fp"], d["Dp"]
    tk, NC, nkpc = d["tk"], d["NC"], d["nk_per_core"]
    nb, B = d["nb"], d["B"]

    # VMEM budget from the actual footprint (+headroom): double-buffered bf16
    # input blocks + (double-buffered) f32 output slab.  16 MiB floor keeps us
    # clear of too-tight compiles; well under v7x's 64 MiB for tk <= 4096.
    xw_bytes = 2 * (R * tk + tk * Dp) * 2
    out_bytes = 2 * R * Dp * 4
    vmem_limit = max(16 << 20, int(1.25 * (xw_bytes + out_bytes)) + (2 << 20))

    partials = pl.pallas_call(
        _accum_kernel,
        out_shape=jax.ShapeDtypeStruct((NC, R, Dp), jnp.float32),
        grid_spec=pltpu.PrefetchScalarGridSpec(
            num_scalar_prefetch=0,
            grid=(NC, nkpc),                       # (core split, F-reduction)
            in_specs=[
                pl.BlockSpec((R, tk), lambda c, k: (0, c * nkpc + k)),   # pixels (bf16)
                pl.BlockSpec((tk, Dp), lambda c, k: (c * nkpc + k, 0)),  # w_img' (bf16)
            ],
            out_specs=pl.BlockSpec((None, R, Dp), lambda c, k: (c, 0, 0)),
        ),
        compiler_params=pltpu.CompilerParams(
            dimension_semantics=("parallel", "arbitrary"),
            vmem_limit_bytes=vmem_limit),
    )(x_stacked, prep["w_img_n"])

    coef = prep["logit_scale"] ** 2 / float(B * B)
    out = pl.pallas_call(
        _make_finalize_kernel(nb, B, coef),
        out_shape=jax.ShapeDtypeStruct((nb, _OUT_LANES), jnp.float32),
    )(partials, prep["bias_feat"], prep["t_hat"])
    return out[:, 0]                                                     # [nb]


def clip_branch_losses(img, prep):
    """Per-branch CLIP losses ([init, target] in dual mode, [target] otherwise)."""
    d = prep["dims"]
    B, F, Fp, R, nb = d["B"], d["F"], d["Fp"], d["R"], d["nb"]

    # self.transform = 180-degree rotation about the center == exact H/W flip;
    # the flip commutes with per-channel normalization (folded into w_img).
    img_rot = jnp.flip(img, axis=(-2, -1))
    imgs = [img, img_rot] if prep["dual"] else [img_rot]
    x = jnp.concatenate([im.reshape(B, F) for im in imgs], axis=0).astype(jnp.float32)
    x = jnp.pad(x, ((0, R - nb * B), (0, Fp - F))).astype(jnp.bfloat16)  # [R, Fp]
    return _branch_losses_from_pixels(x, prep)


def clip_loss_forward(img, prep):
    """Mirrors CLIPLoss.forward (forward values only); returns the target loss."""
    losses = clip_branch_losses(img, prep)
    # TODO(synk): PyTorch also calls clip_loss.backward(retain_graph=True) on the
    # dual/init-branch loss (gradient side effect on the rendered image); only
    # forward values are produced here.  If that side effect is never needed,
    # prepare with dual=False to skip the init branch entirely.
    return losses[-1]                            # target-branch clip_loss


# --------------------------------------------------------------------------
# Naive untiled reference (same bf16 quantization, explicit lpi @ lpi.T).
# --------------------------------------------------------------------------
def _reference_losses(img, params, dual):
    B, C, H, W = img.shape
    F = C * H * W
    mean = jnp.repeat(jnp.asarray(CLIP_MEAN, jnp.float32), H * W)
    std = jnp.repeat(jnp.asarray(CLIP_STD, jnp.float32), H * W)
    w_img = params["w_img"]
    w_n = ((1.0 / std)[:, None] * w_img).astype(jnp.bfloat16).astype(jnp.float32)
    bias_feat = (-(mean / std))[None, :] @ w_img
    s = params["logit_scale"]
    img_rot = jnp.flip(img, axis=(-2, -1))
    branches = ([(img, params["init_tokens"]), (img_rot, params["target_tokens"])]
                if dual else [(img_rot, params["target_tokens"])])
    losses = []
    for im, toks in branches:
        x = im.reshape(B, F).astype(jnp.bfloat16).astype(jnp.float32)
        feats = x @ w_n + bias_feat
        feats = feats / jnp.sqrt(jnp.sum(feats * feats, -1, keepdims=True) + 1e-12)
        pooled = jnp.mean(params["embed"][toks], axis=0, keepdims=True)
        tf = pooled @ params["w_txt"]
        tf = tf / jnp.sqrt(jnp.sum(tf * tf, -1, keepdims=True) + 1e-12)
        lpi = s * feats @ tf.T                                  # [B, 1]
        losses.append(-jnp.mean(lpi @ lpi.T))                   # [B, B] mean
    return jnp.stack(losses)


if __name__ == "__main__":
    # Small shapes consistent with the forward pass (real module: 224x224x3, D=1024).
    B, C, H, W = 2, 3, 16, 16          # rendered image batch, NCHW
    V, L, E, D = 64, 8, 32, 128        # vocab, seq len, text embed, CLIP dim

    key = jax.random.PRNGKey(0)
    k_img, k_wi, k_wt, k_emb = jax.random.split(key, 4)

    img = jax.random.uniform(k_img, (B, C, H, W), jnp.float32)     # render in [0, 1]

    params = {
        "w_img": 0.02 * jax.random.normal(k_wi, (C * H * W, D), jnp.float32),
        "w_txt": 0.02 * jax.random.normal(k_wt, (E, D), jnp.float32),
        "embed": 0.02 * jax.random.normal(k_emb, (V, E), jnp.float32),
        # tokenizer("a word of '<target>'") / ("a word of '<init>'") stand-ins
        "target_tokens": jnp.arange(L, dtype=jnp.int32) % V,
        "init_tokens": (jnp.arange(L, dtype=jnp.int32) * 3 + 1) % V,
        "logit_scale": float(np.exp(np.log(1.0 / 0.07))),          # CLIP logit scale
    }

    # One-time prep of the frozen weights (folded normalization, bf16, t_hat).
    prep = prepare_clip_params(params, img.shape, dual=True, tk=4096, num_core_splits=2)

    loss = clip_loss_forward(img, prep)
    jax.block_until_ready(loss)
    assert loss.shape == () and loss.dtype == jnp.float32

    # numerical sanity check vs a naive (untiled) reference with the same bf16 inputs
    got = clip_branch_losses(img, prep)
    ref = _reference_losses(img, params, dual=True)
    np.testing.assert_allclose(np.asarray(got), np.asarray(ref), rtol=2e-2, atol=1e-2)

    print("KERNEL_OK")
</pallas_src>

<mosaic_0001>
module attributes {stable_mosaic.version = 11 : i64} {
  func.func @_accum_kernel(%arg0: i32, %arg1: i32, %arg2: memref<16x384xbf16, #tpu.memory_space<vmem>>, %arg3: memref<384x128xbf16, #tpu.memory_space<vmem>>, %arg4: memref<1x16x128xf32, #tpu.memory_space<vmem>>) attributes {dimension_semantics = [#tpu.dimension_semantics<parallel>, #tpu.dimension_semantics<arbitrary>], iteration_bounds = array<i64: 2, 1>, scalar_prefetch = 0 : i64, scratch_operands = 0 : i64, tpu.core_type = #tpu.core_type<tc>, window_params = [{transform_indices = @transform_0, window_bounds = array<i64: 16, 384>}, {transform_indices = @transform_1, window_bounds = array<i64: 384, 128>}, {transform_indices = @transform_2, window_bounds = array<i64: 1, 16, 128>}]} {
    %c0_i32 = arith.constant 0 : i32
    %0 = arith.cmpi eq, %arg1, %c0_i32 : i32
    %1 = arith.extui %0 : i1 to i32
    %c0_i32_0 = arith.constant 0 : i32
    %2 = arith.cmpi ne, %1, %c0_i32_0 : i32
    scf.if %2 {
      %cst_10 = arith.constant 0.000000e+00 : f32
      %12 = vector.broadcast %cst_10 : f32 to vector<16x128xf32>
      %c0_11 = arith.constant 0 : index
      %c0_12 = arith.constant 0 : index
      %c0_13 = arith.constant 0 : index
      %13 = vector.load %arg4[%c0_11, %c0_12, %c0_13] : memref<1x16x128xf32, #tpu.memory_space<vmem>>, vector<1x16x128xf32>
      %14 = vector.shape_cast %13 : vector<1x16x128xf32> to vector<16x128xf32>
      %15 = vector.shape_cast %12 : vector<16x128xf32> to vector<1x16x128xf32>
      tpu.vector_store %arg4[%c0_11, %c0_12, %c0_13], %15 {strides = array<i32>} : memref<1x16x128xf32, #tpu.memory_space<vmem>>, vector<1x16x128xf32>,
    } else {
    }
    %c0 = arith.constant 0 : index
    %c0_1 = arith.constant 0 : index
    %c0_2 = arith.constant 0 : index
    %3 = vector.load %arg4[%c0, %c0_1, %c0_2] : memref<1x16x128xf32, #tpu.memory_space<vmem>>, vector<1x16x128xf32>
    %4 = vector.shape_cast %3 : vector<1x16x128xf32> to vector<16x128xf32>
    %c0_3 = arith.constant 0 : index
    %c0_4 = arith.constant 0 : index
    %5 = vector.load %arg2[%c0_3, %c0_4] : memref<16x384xbf16, #tpu.memory_space<vmem>>, vector<16x384xbf16>
    %c0_5 = arith.constant 0 : index
    %c0_6 = arith.constant 0 : index
    %6 = vector.load %arg3[%c0_5, %c0_6] : memref<384x128xbf16, #tpu.memory_space<vmem>>, vector<384x128xbf16>
    %cst = arith.constant dense<0.000000e+00> : vector<16x128xf32>
    %7 = tpu.matmul %5, %6, %cst {dimension_numbers = #tpu.dot_dimension_numbers<[1], [0], [0], [1], [0, 0, 1, 1], [], []>} : vector<16x384xbf16>, vector<384x128xbf16>, vector<16x128xf32> -> vector<16x128xf32>
    %8 = arith.addf %4, %7 : vector<16x128xf32>
    %c0_7 = arith.constant 0 : index
    %c0_8 = arith.constant 0 : index
    %c0_9 = arith.constant 0 : index
    %9 = vector.load %arg4[%c0_7, %c0_8, %c0_9] : memref<1x16x128xf32, #tpu.memory_space<vmem>>, vector<1x16x128xf32>
    %10 = vector.shape_cast %9 : vector<1x16x128xf32> to vector<16x128xf32>
    %11 = vector.shape_cast %8 : vector<16x128xf32> to vector<1x16x128xf32>
    tpu.vector_store %arg4[%c0_7, %c0_8, %c0_9], %11 {strides = array<i32>} : memref<1x16x128xf32, #tpu.memory_space<vmem>>, vector<1x16x128xf32>,
    return
  }
  func.func @transform_0(%arg0: i32, %arg1: i32) -> (i32, i32) {
    %c1_i32 = arith.constant 1 : i32
    %0 = arith.muli %arg0, %c1_i32 : i32
    %1 = arith.addi %0, %arg1 : i32
    %c0_i32 = arith.constant 0 : i32
    %c0_i32_0 = arith.constant 0 : i32
    return %c0_i32, %1 : i32, i32
  }
  func.func @transform_1(%arg0: i32, %arg1: i32) -> (i32, i32) {
    %c1_i32 = arith.constant 1 : i32
    %0 = arith.muli %arg0, %c1_i32 : i32
    %1 = arith.addi %0, %arg1 : i32
    %c0_i32 = arith.constant 0 : i32
    %c0_i32_0 = arith.constant 0 : i32
    return %1, %c0_i32 : i32, i32
  }
  func.func @transform_2(%arg0: i32, %arg1: i32) -> (i32, i32, i32) {
    %c0_i32 = arith.constant 0 : i32
    %c0_i32_0 = arith.constant 0 : i32
    %c0_i32_1 = arith.constant 0 : i32
    return %arg0, %c0_i32, %c0_i32_0 : i32, i32, i32
  }
}

</mosaic_0001>

<bundles_post_ra>
// kernel: tpu_custom_call.1
= control target key start
LH: loop header
LB: loop body
LE: loop exit
PB: predicated region body
PF: predicated region fallthrough
CT: control target
= control target key end

     0   :  { %s1195_s0 = inlined_call_operand.hbm [shape: bf16[16,768], index: 0, kind: input, shape index: {}]   ;;  %s1196_s1 = inlined_call_operand.hbm [shape: bf16[768,128], index: 1, kind: input, shape index: {}]   ;;  %s1197_s2 = inlined_call_operand.hbm [shape: f32[2,16,128], index: 2, kind: output, shape index: {}]  }
   0x1   :  { %1199 = sst [smem:[#allocation12_spill]] %s1195_s0 }
   0x2   :  { %7 = vsyncpa [#allocation3], 0 }
   0x3   :  { %9 = vsyncpa [#allocation3 + $0x1], 0 }
   0x4   :  { %10 = vsyncpa [#allocation6], 0 }
   0x5   :  { %12 = vsyncpa [#allocation6 + $0x1], 0 }
   0x6   :  { %13 = vsyncpa [#allocation4], 0 }
   0x7   :  { %15 = vsyncpa [#allocation4 + $0x1], 0  ;;  %s1016_s9 = smov 0   ;;  %s1018_s10 = smov 0  }
   0x8   :  { %s1020_s11 = smov 0   ;;  %s1022_s12 = smov 0  }
   0x9   :  { %s1024_s13 = smov 0   ;;  %s1026_s14 = smov 0  }
   0xa LB: > { %s616_s15 = sadd.s32 4294967295, %s992_s14   ;;  %s617_s16 = sadd.s32 4294967294, %s992_s14   ;;  %s992_s14 = sphi %s1026_s14, %s21_s14   ;;  %s988_s13 = sphi %s1024_s13, %s1212_s13   ;;  %s984_s12 = sphi %s1022_s12, %s1211_s12   ;;  %s980_s11 = sphi %s1020_s11, %s1210_s11   ;;  %s976_s10 = sphi %s1018_s10, %s1209_s10   ;;  %s972_s9 = sphi %s1016_s9, %s1208_s9  }
   0xb   : > { %s33_s17 = sadd.s32 1, %s988_s13  ;;  %s42_s18 = sadd.s32 1, %s980_s11 }
   0xc   : > { %p35_p0 = scmp.ge.s32.totalorder %s33_s17, 2  ;;  %p49_p1 = scmp.ne.s32.totalorder %s980_s11, %s976_s10 }
   0xd   : > { %p50_p2 = scmp.eq.s32.totalorder %s992_s14, 0  ;;  %p55_p3 = scmp.ne.s32.totalorder %s976_s10, %s972_s9 }
   0xe   : > { %s1214_s17 = smov (%p35_p0, %s33_s17), 0  ;;  %p56_p5 = scmp.eq.s32.totalorder %s616_s15, 0 }
   0xf   : > { %1200 = sst [smem:[#allocation11_spill]] %s1214_s17  ;;  %p1057_p4 = por %p50_p2, %p49_p1 }
  0x10   : > { %s39_s20 = ssub.s32 %s988_s13, %s1214_s17  ;;  %p107_p6 = scmp.eq.s32.totalorder %s616_s15, 1 }
  0x11   : > { %p40_p7 = scmp.eq.s32.totalorder %s39_s20, 0  ;;  %p1063_p8 = por %p56_p5, %p55_p3 }
  0x12   : > { %p1067_p9 = por %p107_p6, %p49_p1  ;;  %p113_p10 = scmp.eq.s32.totalorder %s617_s16, 1 }
  0x13   : > { %s1072_s23 = scalar_select %p40_p7, %s980_s11, %s42_s18  }
  0x14   : > { %p1074_p11 = por %p113_p10, %p55_p3  ;;  %p619_p12 = scmp.ge.s32.totalorder %s992_s14, 2 }
  0x15   : > { %p788_p13 = scmp.lt.s32.totalorder %s992_s14, 2  ;;  %s1081_s25 = sand.u32 1, %s980_s11  }
  0x16   : > { %s767_s26 = smul.u32 24, %s1081_s25  ;;  %s1206_s0 = sld [smem:[#allocation12_spill]] }
  0x17   : > { %s737_s27 = smul.u32 12, %s988_s13  ;;  %p1087_p0 = pnand %p788_p13, %p1057_p4 }
  0x18   : > { %s137_s4 = scalar_lea.vmem [#allocation2], %s767_s26  ;;  %s134_s7 = scalar_lea.sflag [#allocation3], %s1081_s25 }
  0x19   : > { %s146_s5 = sshll.u32 %s137_s4, 4  ;;  %s994_s8 = smov 384   ;;  %s147_s5 = int_to_ptr.vmem [resolvable:$true] %s146_s5 }
  0x1a   : > { %s995_s15 = smov 192   ;;  %s996_s16 = smov 12  }
  0x1b   : > { %p622_p1 = scmp.ge.s32.totalorder %s992_s14, 1  ;;  %p177_p2 = scmp.lt.s32.totalorder %s992_s14, 3 }
  0x1c   : > { %s143_s3 = scalar_lea.hbm %s1206_s0, %s737_s27  ;;  %s768_s18 = smul.u32 192, %s1081_s25 }
  0x1d   : > { %s144_s6 = sshll.u32 %s143_s3, 4  ;;  %p178_p3 = pnand %p622_p1, %p177_p2  ;;  %s145_s6 = int_to_ptr.hbm [resolvable:$true] %s144_s6 }
  0x1e   : > { %780 = dma.hbm_to_vmem [thread:$0]  (!%p1087_p0), %s145_s6, 384, %s147_s5, %s134_s7, %s994_s8, %s995_s15, %s996_s16  }
  0x1f   : > { %s738_s19 = smul.u32 192, %s988_s13  ;;  %s160_s29 = scalar_lea.vmem [#allocation5], %s768_s18 }
  0x20   : > { %s169_s30 = sshll.u32 %s160_s29, 4  ;;  %s157_s4 = scalar_lea.sflag [#allocation6], %s1081_s25  ;;  %s170_s30 = int_to_ptr.vmem [resolvable:$true] %s169_s30 }
  0x21   : > { %s166_s26 = scalar_lea.hbm %s1196_s1, %s738_s19  ;;  %s997_s0 = smov 64  }
  0x22   : > { %s167_s3 = sshll.u32 %s166_s26, 4  ;;  %s998_s17 = smov 4   ;;  %s168_s3 = int_to_ptr.hbm [resolvable:$true] %s167_s3 }
  0x23   : > { %783 = dma.hbm_to_vmem [thread:$0]  (!%p1087_p0), %s168_s3, 3072, %s170_s30, %s157_s4, %s997_s0, %s997_s0, %s998_s17  }
  0x24   : > { %181 = sbr.rel (%p178_p3) target bundleno = 226 (0xe2), region = 28  ;;  %s1108_s5 = sand.u32 (!%p178_p3), 1, %s976_s10  }
  0x25   : > { %s769_s6 = smul.u32 (!%p178_p3), 24, %s1108_s5  ;;  %s184_s7 = scalar_lea.sflag (!%p178_p3), [#allocation3], %s1108_s5 }
  0x27   : > { %s1112_s8 = scalar_lea.vmem (!%p178_p3), [#allocation2], %s769_s6 }
  0x29   : > { %959 = dma.done.wait (%p1063_p8), %s184_s7, 384  }
  0x2a   : > { %961 = vsyncadd (%p1063_p8), %s184_s7, 4294966912  ;;  %s770_s0 = smul.u32 192, %s1108_s5  ;;  %s194_s17 = scalar_lea.sflag [#allocation6], %s1108_s5 }
  0x2c   : > { %s1120_s25 = scalar_lea.vmem [#allocation5], %s770_s0 }
  0x2d   : > { %963 = dma.done.wait (%p1063_p8), %s194_s17, 3072  }
  0x2e   : > { %965 = vsyncadd (%p1063_p8), %s194_s17, 4294964224  ;;  %v749_v0 = vld [vmem:[%s1120_s25 + $0x38] sm:$0xff]  ;;  %v748_v3 = vld [vmem:[%s1120_s25 + $0x30] sm:$0xff]  ;;  %s623_s21 = sshll.u32 %s1108_s5, 4  ;;  %s766_s28 = sshll.u32 %s984_s12, 4 }
  0x2f   : > { %v757_v1 = vld [vmem:[%s1120_s25 + $0x78] sm:$0xff]  ;;  %448 = vmatpush.bf16.msra.mxu0 %v749_v0  ;;  %v756_v4 = vld [vmem:[%s1120_s25 + $0x70] sm:$0xff]  ;;  %v747_v6 = vld [vmem:[%s1120_s25 + $0x28] sm:$0xff]  ;;  %s506_s18 = scalar_lea.hbm %s1197_s2, %s766_s28  ;;  %s223_s19 = scalar_lea.vmem [#allocation7], %s623_s21 }
  0x30   : > { %v765_v2 = vld [vmem:[%s1120_s25 + $0xb8] sm:$0xff]  ;;  %462 = vmatpush.bf16.msra.mxu1 %v757_v1  ;;  %v764_v5 = vld [vmem:[%s1120_s25 + $0xb0] sm:$0xff]  ;;  %v755_v7 = vld [vmem:[%s1120_s25 + $0x68] sm:$0xff]  ;;  %s507_s20 = sshll.u32 %s223_s19, 4  ;;  %s509_s27 = sshll.u32 %s506_s18, 4  ;;  %s508_s20 = int_to_ptr.vmem [resolvable:$true] %s507_s20  ;;  %s510_s27 = int_to_ptr.hbm [resolvable:$true] %s509_s27 }
  0x31   : > { %476 = vmatpush.bf16.msra.mxu2 %v765_v2  ;;  %v763_v8 = vld [vmem:[%s1120_s25 + $0xa8] sm:$0xff]  ;;  %v746_v9 = vld [vmem:[%s1120_s25 + $0x20] sm:$0xff]  ;;  %v745_v12 = vld [vmem:[%s1120_s25 + $0x18] sm:$0xff]  ;;  %s495_s26 = scalar_lea.sflag [#allocation4], %s1108_s5  ;;  %s920_s29 = sshra.s32 %s510_s27, 4  ;;  %s921_s29 = int_to_ptr.hbm [resolvable:$true] %s920_s29 }
  0x32   : > { %v754_v10 = vld [vmem:[%s1120_s25 + $0x60] sm:$0xff]  ;;  %v753_v13 = vld [vmem:[%s1120_s25 + $0x58] sm:$0xff]  ;;  %v744_v15 = vld [vmem:[%s1120_s25 + $0x10] sm:$0xff]  ;;  %s922_s12 = scalar_lea.hbm %s921_s29, 16  ;;  %s926_s4 = scalar_lea.hbm %s1197_s2, 32 }
  0x33   : > { %449 = vmatpush.bf16.msra.mxu0 %v748_v3  ;;  %v762_v11 = vld [vmem:[%s1120_s25 + $0xa0] sm:$0xff]  ;;  %v761_v14 = vld [vmem:[%s1120_s25 + $0x98] sm:$0xff]  ;;  %v752_v16 = vld [vmem:[%s1120_s25 + $0x50] sm:$0xff]  ;;  %p923_p4 = scmp.ne.s32.totalorder %s921_s29, %s922_s12  ;;  %p927_p7 = scmp.lt.s32.totalorder %s921_s29, %s1197_s2 }
  0x34   : > { %463 = vmatpush.bf16.msra.mxu1 %v756_v4  ;;  %v760_v17 = vld [vmem:[%s1120_s25 + $0x90] sm:$0xff]  ;;  %v743_v18 = vld [vmem:[%s1120_s25 + $0x8] sm:$0xff]  ;;  %v742_v21 = vld [vmem:[%s1120_s25] sm:$0xff]  ;;  %p928_p8 = scmp.lt.s32.totalorder %s926_s4, %s922_s12 }
  0x35   : > { %477 = vmatpush.bf16.msra.mxu2 %v764_v5  ;;  %v751_v19 = vld [vmem:[%s1120_s25 + $0x48] sm:$0xff]  ;;  %v750_v22 = vld [vmem:[%s1120_s25 + $0x40] sm:$0xff]  ;;  %v740_v24 = vld [vmem:[%s1112_s8 + $0x8] sm:$0xf0]  ;;  %p924_p5 = pnand %p923_p4, %p1067_p9 }
  0x36   : > { %v759_v20 = vld [vmem:[%s1120_s25 + $0x88] sm:$0xff]  ;;  %v628_v26 = vld [vmem:[%s1112_s8 + $0xc] sm:$0xf0]  ;;  %v634_v28 = vld [vmem:[%s1112_s8 + $0x8] sm:$0xf]  ;;  %p929_p10 = por %p928_p8, %p927_p7 }
  0x37   : > { %450 = vmatpush.bf16.msra.mxu0 %v747_v6  ;;  %v626_v23 = vld [vmem:[%s1112_s8] sm:$0xf]  ;;  %v739_v25 = vld [vmem:[%s1112_s8 + $0x4] sm:$0xf]  ;;  %v758_v27 = vld [vmem:[%s1120_s25 + $0x80] sm:$0xff]  ;;  %p925_p6 = pneg %p924_p5 }
  0x38   : > { %464 = vmatpush.bf16.msra.mxu1 %v755_v7  ;;  %v741_v29 = vld [vmem:[%s1112_s8 + $0x10] sm:$0xf0]  ;;  %v627_v30 = vor.u32 %v740_v24, %v626_v23  ;;  %v631_v31 = vor.u32 %v739_v25, %v628_v26 }
  0x39   : > { %478 = vmatpush.bf16.msra.mxu2 %v763_v8  ;;  %v635_v32 = vor.u32 %v741_v29, %v634_v28  ;;  %p930_p13 = pnand %p929_p10, %p925_p6 }
  0x3b   : > { %451 = vmatpush.bf16.msra.mxu0 %v746_v9 }
  0x3c   : > { %465 = vmatpush.bf16.msra.mxu1 %v754_v10 }
  0x3d   : > { %479 = vmatpush.bf16.msra.mxu2 %v762_v11 }
  0x3f   : > { %452 = vmatpush.bf16.msra.mxu0 %v745_v12 }
  0x40   : > { %466 = vmatpush.bf16.msra.mxu1 %v753_v13 }
  0x41   : > { %480 = vmatpush.bf16.msra.mxu2 %v761_v14 }
  0x43   : > { %453 = vmatpush.bf16.msra.mxu0 %v744_v15 }
  0x44   : > { %467 = vmatpush.bf16.msra.mxu1 %v752_v16 }
  0x45   : > { %481 = vmatpush.bf16.msra.mxu2 %v760_v17 }
  0x47   : > { %454 = vmatpush.bf16.msra.mxu0 %v743_v18 }
  0x48   : > { %468 = vmatpush.bf16.msra.mxu1 %v751_v19 }
  0x49   : > { %482 = vmatpush.bf16.msra.mxu2 %v759_v20 }
  0x4b   : > { %455 = vmatpush.bf16.msra.mxu0 %v742_v21 }
  0x4c   : > { %469 = vmatpush.bf16.msra.mxu1 %v750_v22 }
  0x4d   : > { %483 = vmatpush.bf16.msra.mxu2 %v758_v27 }
  0x4e   : > { %456 = vmatmul.bf16.vlgmr.msra.gmra.mxu0 %v627_v30 }
  0x4f   : > { %470 = vmatmul.bf16.vlgmr.msra.gmra.mxu1 %v631_v31 }
  0x50   : > { %484 = vmatmul.bf16.vlgmr.msra.gmra.mxu2 %v635_v32 }
  0xcb   : > { %v457_v33 = vpop.f32.mrf.mxu0 }
  0xcc   : > { %v471_v34 = vpop.f32.mrf.mxu1 }
  0xcd   : > { %v472_v35 = vadd.f32 %v471_v34, %v457_v33 }
  0xd3   : > { %v485_v36 = vpop.f32.mrf.mxu2  ;;  %v459_v38 = vpop.f32.mrf.mxu0 }
  0xd4   : > { %v486_v37 = vadd.f32 %v485_v36, %v472_v35  ;;  %v473_v39 = vpop.f32.mrf.mxu1 }
  0xd5   : > { %v474_v40 = vadd.f32 %v473_v39, %v459_v38 }
  0xd6   : > { %492 = vst [vmem:[%s223_s19] sm:$0xff] %v486_v37 }
  0xdb   : > { %v487_v41 = vpop.f32.mrf.mxu2 }
  0xdc   : > { %v488_v42 = vadd.f32 %v487_v41, %v474_v40 }
  0xde   : > { %493 = vst [vmem:[%s223_s19 + $0x8] sm:$0xff] %v488_v42 }
  0xdf   : > { %933 = shalt.err (!%p930_p13)
}
  0xe0   : > { %s999_s5 = smov 128   ;;  %s1000_s8 = smov 8  }
  0xe1   : > { %775 = dma.vmem_to_hbm [thread:$0]  (%p1067_p9), %s508_s20, 256, %s510_s27, %s495_s26, %s999_s5, %s999_s5, %s1000_s8  }
  0xe2 PF: > { %s524_s0 = sand.u32 1, %s972_s9   ;;  %p785_p0 = pnand %p619_p12, %p1074_p11 }
  0xe3   : > { %s525_s17 = scalar_lea.sflag [#allocation4], %s524_s0 }
  0xe4   : > { %p786_p1 = pneg %p785_p0 }
  0xe6   : > { %967 = dma.done.wait (%p786_p1), %s525_s17, 256  }
  0xe7   : > { %969 = vsyncadd (%p786_p1), %s525_s17, 4294967040  ;;  %s21_s14 = sadd.s32 1, %s992_s14   ;;  %s1207_s22 = sld [smem:[#allocation11_spill]] }
  0xe8   : > { %p18_p2 = scmp.ge.s32.totalorder %s21_s14, 4   ;;  %s1208_s9 = smov %s976_s10 }
  0xe9   : > { %s1209_s10 = smov %s980_s11  ;;  %s1210_s11 = smov %s1072_s23 }
  0xea   : > { %s1211_s12 = smov %s988_s13  ;;  %20 = sbr.rel (!%p18_p2) target bundleno = 10 (0xa), region = 90 }
  0xed   : > { %s1212_s13 = smov %s1207_s22 }
  0xef   :  { %531 = vsyncpa [#allocation3], 1 }
  0xf0   :  { %533 = vsyncpa [#allocation3 + $0x1], 1 }
  0xf1   :  { %534 = vsyncpa [#allocation6], 1 }
  0xf2   :  { %536 = vsyncpa [#allocation6 + $0x1], 1 }
  0xf3   :  { %537 = vsyncpa [#allocation4], 1 }
  0xf4   :  { %539 = vsyncpa [#allocation4 + $0x1], 1 }

</bundles_post_ra>
